<compile_context>
chip_gen: v5e
topology: v5e:2x2
jax: 0.10.0
libtpu: 0.0.40
codegen_flags: <defaults>
</compile_context>

<pallas_src>
import functools

import jax
import jax.numpy as jnp
from jax import lax
from jax.experimental import pallas as pl
from jax.experimental.pallas import tpu as pltpu

_VMEM_LIMIT = 48 << 20      # leave headroom on v7x (64 MiB physical VMEM)
_BLOCK_ELEMS = 1 << 20      # ~4 MiB f32 per data block
_LANE_TARGET = 8192         # preferred max lane-axis tile (L = D*H*W elements)
_ROW_QUANTUM = 8            # sublane quantum
_LANE_QUANTUM = 128         # lane quantum


def _largest_divisor(total, cap, quantum):
    """Largest divisor of `total` that is a multiple of `quantum` and <= cap.

    Falls back to `total` (full-dim block, always a legal BlockSpec) when
    `total <= cap` or no suitable divisor exists (e.g. awkward prime sizes).
    """
    if total <= cap:
        return total
    start = (cap // quantum) * quantum
    for cand in range(start, 0, -quantum):
        if total % cand == 0:
            return cand
    return total


def _pick_tiles(nc, l):
    """Joint (rows, lanes) tile choice under a per-block element budget."""
    t_lane = _largest_divisor(l, min(_LANE_TARGET, _BLOCK_ELEMS), _LANE_QUANTUM)
    row_cap = max(_ROW_QUANTUM, _BLOCK_ELEMS // max(t_lane, 1))
    t_rows = _largest_divisor(nc, row_cap, _ROW_QUANTUM)
    return t_rows, t_lane


def _stats_kernel(x_ref, sum_ref, sumsq_ref):
    """Pass 1: accumulate per-row sum and sum-of-squares over the L axis.

    x_ref            : (T_ROWS, T_L) f32 tile of one plane
    sum_ref/sumsq_ref: (T_ROWS, 1)   f32 accumulators, resident across the
                       reduction (last) grid axis.
    Grid = (plane, row_block, l_block).
    """
    @pl.when(pl.program_id(2) == 0)
    def _init():
        sum_ref[...] = jnp.zeros_like(sum_ref)
        sumsq_ref[...] = jnp.zeros_like(sumsq_ref)

    x = x_ref[...]                       # single load of the tile
    sum_ref[...] += jnp.sum(x, axis=-1, keepdims=True)
    sumsq_ref[...] += jnp.sum(x * x, axis=-1, keepdims=True)


def _normalize_kernel(x_ref, scale_ref, shift_ref, o_ref):
    """Pass 2: y = x * scale + shift (affine folded into two per-row scalars)."""
    o_ref[...] = (x_ref[...] * scale_ref[...] + shift_ref[...]).astype(o_ref.dtype)


@functools.partial(jax.jit, static_argnames=("eps",))
def complex_batchnorm3d(x, gamma_r, beta_r, gamma_i, beta_i, eps=1e-5):
    """x: complex64 (N, C, D, H, W) — PyTorch NCDHW convention."""
    N, C, D, H, W = x.shape
    L = D * H * W
    NC = N * C

    # Free reshapes, no transpose: rows are (n, c) pairs, L stays lane-dense.
    # One fused XLA deinterleave produces the (2, NC, L) staging buffer.
    xr = jnp.real(x).astype(jnp.float32).reshape(NC, L)
    xi = jnp.imag(x).astype(jnp.float32).reshape(NC, L)
    xs = jnp.stack([xr, xi], axis=0)                     # (2, NC, L)

    t_rows, t_lane = _pick_tiles(NC, L)
    grid = (2, NC // t_rows, L // t_lane)

    data_spec = pl.BlockSpec((None, t_rows, t_lane), lambda p, i, l: (p, i, l))
    row_spec = pl.BlockSpec((None, t_rows, 1), lambda p, i, l: (p, i, 0))

    # ---- Pass 1: per-row sum / sumsq (single traversal of x). ----
    sums, sumsqs = pl.pallas_call(
        _stats_kernel,
        grid=grid,
        in_specs=[data_spec],
        out_specs=(row_spec, row_spec),
        out_shape=(jax.ShapeDtypeStruct((2, NC, 1), jnp.float32),
                   jax.ShapeDtypeStruct((2, NC, 1), jnp.float32)),
        compiler_params=pltpu.CompilerParams(
            dimension_semantics=("parallel", "parallel", "arbitrary"),
            vmem_limit_bytes=_VMEM_LIMIT),
    )(xs)

    # ---- Tiny per-channel combine in plain JAX (O(N*C) scalars). ----
    count = jnp.float32(N * L)
    total = jnp.sum(sums.reshape(2, N, C), axis=1)       # (2, C)
    total_sq = jnp.sum(sumsqs.reshape(2, N, C), axis=1)  # (2, C)
    mean = total / count
    var = jnp.maximum(total_sq / count - mean * mean, 0.0)   # biased variance

    gamma = jnp.stack([gamma_r, gamma_i]).astype(jnp.float32)  # (2, C)
    beta = jnp.stack([beta_r, beta_i]).astype(jnp.float32)     # (2, C)
    scale = gamma * lax.rsqrt(var + eps)                       # (2, C)
    shift = beta - mean * scale                                # (2, C)

    # Broadcast per-channel scalars to per-row ((n, c)-pair) scalars.
    scale_rows = jnp.broadcast_to(scale[:, None, :], (2, N, C)).reshape(2, NC, 1)
    shift_rows = jnp.broadcast_to(shift[:, None, :], (2, N, C)).reshape(2, NC, 1)

    # ---- Pass 2: normalize (writes over the staging buffer via aliasing). ----
    ys = pl.pallas_call(
        _normalize_kernel,
        grid=grid,
        in_specs=[data_spec, row_spec, row_spec],
        out_specs=data_spec,
        out_shape=jax.ShapeDtypeStruct((2, NC, L), jnp.float32),
        input_output_aliases={0: 0},
        compiler_params=pltpu.CompilerParams(
            dimension_semantics=("parallel", "parallel", "parallel"),
            vmem_limit_bytes=_VMEM_LIMIT),
    )(xs, scale_rows, shift_rows)

    yr = ys[0].reshape(N, C, D, H, W)
    yi = ys[1].reshape(N, C, D, H, W)
    return lax.complex(yr, yi)


def _reference(x, gamma_r, beta_r, gamma_i, beta_i, eps=1e-5):
    """Pure-JAX reference mirroring PyTorch BatchNorm3d training-mode forward."""
    def bn(p, g, b):
        mean = jnp.mean(p, axis=(0, 2, 3, 4), keepdims=True)
        var = jnp.mean((p - mean) ** 2, axis=(0, 2, 3, 4), keepdims=True)
        gg = g.reshape(1, -1, 1, 1, 1)
        bb = b.reshape(1, -1, 1, 1, 1)
        return (p - mean) * lax.rsqrt(var + eps) * gg + bb
    return bn(jnp.real(x), gamma_r, beta_r) + 1j * bn(jnp.imag(x), gamma_i, beta_i)


if __name__ == "__main__":
    key = jax.random.PRNGKey(0)
    k_xr, k_xi, k_gr, k_br, k_gi, k_bi = jax.random.split(key, 6)

    # Small shapes consistent with a BatchNorm3d forward: (N, C, D, H, W).
    N, C, D, H, W = 2, 4, 4, 8, 8
    xr = jax.random.normal(k_xr, (N, C, D, H, W), dtype=jnp.float32)
    xi = jax.random.normal(k_xi, (N, C, D, H, W), dtype=jnp.float32)
    x = (xr + 1j * xi).astype(jnp.complex64)

    # Deterministic affine params (PyTorch default is weight=1, bias=0; perturb
    # them so the affine path is exercised).
    gamma_r = 1.0 + 0.1 * jax.random.normal(k_gr, (C,), dtype=jnp.float32)
    beta_r = 0.1 * jax.random.normal(k_br, (C,), dtype=jnp.float32)
    gamma_i = 1.0 + 0.1 * jax.random.normal(k_gi, (C,), dtype=jnp.float32)
    beta_i = 0.1 * jax.random.normal(k_bi, (C,), dtype=jnp.float32)

    out = complex_batchnorm3d(x, gamma_r, beta_r, gamma_i, beta_i)
    out = jax.block_until_ready(out)

    ref = _reference(x, gamma_r, beta_r, gamma_i, beta_i)
    assert out.shape == x.shape and out.dtype == jnp.complex64
    assert jnp.allclose(out, ref, atol=1e-4, rtol=1e-4)

    print("KERNEL_OK")
</pallas_src>

<mosaic_0001>
module attributes {stable_mosaic.version = 11 : i64} {
  func.func @_stats_kernel(%arg0: i32, %arg1: i32, %arg2: i32, %arg3: memref<1x8x256xf32, #tpu.memory_space<vmem>>, %arg4: memref<1x8x1xf32, #tpu.memory_space<vmem>>, %arg5: memref<1x8x1xf32, #tpu.memory_space<vmem>>) attributes {dimension_semantics = [#tpu.dimension_semantics<parallel>, #tpu.dimension_semantics<parallel>, #tpu.dimension_semantics<arbitrary>], iteration_bounds = array<i64: 2, 1, 1>, scalar_prefetch = 0 : i64, scratch_operands = 0 : i64, tpu.core_type = #tpu.core_type<tc>, window_params = [{transform_indices = @transform_0, window_bounds = array<i64: 1, 8, 256>}, {transform_indices = @transform_1, window_bounds = array<i64: 1, 8, 1>}, {transform_indices = @transform_2, window_bounds = array<i64: 1, 8, 1>}]} {
    %c0_i32 = arith.constant 0 : i32
    %0 = arith.cmpi eq, %arg2, %c0_i32 : i32
    %1 = arith.extui %0 : i1 to i32
    %c0_i32_0 = arith.constant 0 : i32
    %2 = arith.cmpi ne, %1, %c0_i32_0 : i32
    scf.if %2 {
      %cst_16 = arith.constant 0.000000e+00 : f32
      %22 = vector.broadcast %cst_16 : f32 to vector<8x1xf32>
      %c0_17 = arith.constant 0 : index
      %c0_18 = arith.constant 0 : index
      %c0_19 = arith.constant 0 : index
      %23 = vector.load %arg4[%c0_17, %c0_18, %c0_19] : memref<1x8x1xf32, #tpu.memory_space<vmem>>, vector<1x8x1xf32>
      %24 = vector.shape_cast %23 : vector<1x8x1xf32> to vector<8x1xf32>
      %25 = vector.shape_cast %22 : vector<8x1xf32> to vector<1x8x1xf32>
      tpu.vector_store %arg4[%c0_17, %c0_18, %c0_19], %25 {strides = array<i32>} : memref<1x8x1xf32, #tpu.memory_space<vmem>>, vector<1x8x1xf32>,
      %cst_20 = arith.constant 0.000000e+00 : f32
      %26 = vector.broadcast %cst_20 : f32 to vector<8x1xf32>
      %c0_21 = arith.constant 0 : index
      %c0_22 = arith.constant 0 : index
      %c0_23 = arith.constant 0 : index
      %27 = vector.load %arg5[%c0_21, %c0_22, %c0_23] : memref<1x8x1xf32, #tpu.memory_space<vmem>>, vector<1x8x1xf32>
      %28 = vector.shape_cast %27 : vector<1x8x1xf32> to vector<8x1xf32>
      %29 = vector.shape_cast %26 : vector<8x1xf32> to vector<1x8x1xf32>
      tpu.vector_store %arg5[%c0_21, %c0_22, %c0_23], %29 {strides = array<i32>} : memref<1x8x1xf32, #tpu.memory_space<vmem>>, vector<1x8x1xf32>,
    } else {
    }
    %c0 = arith.constant 0 : index
    %c0_1 = arith.constant 0 : index
    %c0_2 = arith.constant 0 : index
    %3 = vector.load %arg3[%c0, %c0_1, %c0_2] : memref<1x8x256xf32, #tpu.memory_space<vmem>>, vector<1x8x256xf32>
    %4 = vector.shape_cast %3 : vector<1x8x256xf32> to vector<8x256xf32>
    %c0_3 = arith.constant 0 : index
    %c0_4 = arith.constant 0 : index
    %c0_5 = arith.constant 0 : index
    %5 = vector.load %arg4[%c0_3, %c0_4, %c0_5] : memref<1x8x1xf32, #tpu.memory_space<vmem>>, vector<1x8x1xf32>
    %6 = vector.shape_cast %5 : vector<1x8x1xf32> to vector<8x1xf32>
    %cst = arith.constant dense<0.000000e+00> : vector<8xf32>
    %7 = vector.multi_reduction <add>, %4, %cst [1] : vector<8x256xf32> to vector<8xf32>
    %8 = vector.shape_cast %7 : vector<8xf32> to vector<8x1xf32>
    %9 = arith.addf %6, %8 : vector<8x1xf32>
    %c0_6 = arith.constant 0 : index
    %c0_7 = arith.constant 0 : index
    %c0_8 = arith.constant 0 : index
    %10 = vector.load %arg4[%c0_6, %c0_7, %c0_8] : memref<1x8x1xf32, #tpu.memory_space<vmem>>, vector<1x8x1xf32>
    %11 = vector.shape_cast %10 : vector<1x8x1xf32> to vector<8x1xf32>
    %12 = vector.shape_cast %9 : vector<8x1xf32> to vector<1x8x1xf32>
    tpu.vector_store %arg4[%c0_6, %c0_7, %c0_8], %12 {strides = array<i32>} : memref<1x8x1xf32, #tpu.memory_space<vmem>>, vector<1x8x1xf32>,
    %c0_9 = arith.constant 0 : index
    %c0_10 = arith.constant 0 : index
    %c0_11 = arith.constant 0 : index
    %13 = vector.load %arg5[%c0_9, %c0_10, %c0_11] : memref<1x8x1xf32, #tpu.memory_space<vmem>>, vector<1x8x1xf32>
    %14 = vector.shape_cast %13 : vector<1x8x1xf32> to vector<8x1xf32>
    %15 = arith.mulf %4, %4 : vector<8x256xf32>
    %cst_12 = arith.constant dense<0.000000e+00> : vector<8xf32>
    %16 = vector.multi_reduction <add>, %15, %cst_12 [1] : vector<8x256xf32> to vector<8xf32>
    %17 = vector.shape_cast %16 : vector<8xf32> to vector<8x1xf32>
    %18 = arith.addf %14, %17 : vector<8x1xf32>
    %c0_13 = arith.constant 0 : index
    %c0_14 = arith.constant 0 : index
    %c0_15 = arith.constant 0 : index
    %19 = vector.load %arg5[%c0_13, %c0_14, %c0_15] : memref<1x8x1xf32, #tpu.memory_space<vmem>>, vector<1x8x1xf32>
    %20 = vector.shape_cast %19 : vector<1x8x1xf32> to vector<8x1xf32>
    %21 = vector.shape_cast %18 : vector<8x1xf32> to vector<1x8x1xf32>
    tpu.vector_store %arg5[%c0_13, %c0_14, %c0_15], %21 {strides = array<i32>} : memref<1x8x1xf32, #tpu.memory_space<vmem>>, vector<1x8x1xf32>,
    return
  }
  func.func @transform_0(%arg0: i32, %arg1: i32, %arg2: i32) -> (i32, i32, i32) {
    %c0_i32 = arith.constant 0 : i32
    return %arg0, %arg1, %arg2 : i32, i32, i32
  }
  func.func @transform_1(%arg0: i32, %arg1: i32, %arg2: i32) -> (i32, i32, i32) {
    %c0_i32 = arith.constant 0 : i32
    %c0_i32_0 = arith.constant 0 : i32
    return %arg0, %arg1, %c0_i32 : i32, i32, i32
  }
  func.func @transform_2(%arg0: i32, %arg1: i32, %arg2: i32) -> (i32, i32, i32) {
    %c0_i32 = arith.constant 0 : i32
    %c0_i32_0 = arith.constant 0 : i32
    return %arg0, %arg1, %c0_i32 : i32, i32, i32
  }
}

module attributes {stable_mosaic.version = 11 : i64} {
  func.func @_normalize_kernel(%arg0: i32, %arg1: i32, %arg2: i32, %arg3: memref<1x8x256xf32, #tpu.memory_space<vmem>>, %arg4: memref<1x8x1xf32, #tpu.memory_space<vmem>>, %arg5: memref<1x8x1xf32, #tpu.memory_space<vmem>>, %arg6: memref<1x8x256xf32, #tpu.memory_space<vmem>>) attributes {dimension_semantics = [#tpu.dimension_semantics<parallel>, #tpu.dimension_semantics<parallel>, #tpu.dimension_semantics<parallel>], iteration_bounds = array<i64: 2, 1, 1>, scalar_prefetch = 0 : i64, scratch_operands = 0 : i64, tpu.core_type = #tpu.core_type<tc>, window_params = [{transform_indices = @transform_0, window_bounds = array<i64: 1, 8, 256>}, {transform_indices = @transform_1, window_bounds = array<i64: 1, 8, 1>}, {transform_indices = @transform_2, window_bounds = array<i64: 1, 8, 1>}, {transform_indices = @transform_3, window_bounds = array<i64: 1, 8, 256>}]} {
    %c0 = arith.constant 0 : index
    %c0_0 = arith.constant 0 : index
    %c0_1 = arith.constant 0 : index
    %0 = vector.load %arg3[%c0, %c0_0, %c0_1] : memref<1x8x256xf32, #tpu.memory_space<vmem>>, vector<1x8x256xf32>
    %1 = vector.shape_cast %0 : vector<1x8x256xf32> to vector<8x256xf32>
    %c0_2 = arith.constant 0 : index
    %c0_3 = arith.constant 0 : index
    %c0_4 = arith.constant 0 : index
    %2 = vector.load %arg4[%c0_2, %c0_3, %c0_4] : memref<1x8x1xf32, #tpu.memory_space<vmem>>, vector<1x8x1xf32>
    %3 = vector.shape_cast %2 : vector<1x8x1xf32> to vector<8x1xf32>
    %4 = vector.broadcast %3 : vector<8x1xf32> to vector<8x256xf32>
    %5 = arith.mulf %1, %4 : vector<8x256xf32>
    %c0_5 = arith.constant 0 : index
    %c0_6 = arith.constant 0 : index
    %c0_7 = arith.constant 0 : index
    %6 = vector.load %arg5[%c0_5, %c0_6, %c0_7] : memref<1x8x1xf32, #tpu.memory_space<vmem>>, vector<1x8x1xf32>
    %7 = vector.shape_cast %6 : vector<1x8x1xf32> to vector<8x1xf32>
    %8 = vector.broadcast %7 : vector<8x1xf32> to vector<8x256xf32>
    %9 = arith.addf %5, %8 : vector<8x256xf32>
    %c0_8 = arith.constant 0 : index
    %c0_9 = arith.constant 0 : index
    %c0_10 = arith.constant 0 : index
    %10 = vector.load %arg6[%c0_8, %c0_9, %c0_10] : memref<1x8x256xf32, #tpu.memory_space<vmem>>, vector<1x8x256xf32>
    %11 = vector.shape_cast %10 : vector<1x8x256xf32> to vector<8x256xf32>
    %12 = vector.shape_cast %9 : vector<8x256xf32> to vector<1x8x256xf32>
    tpu.vector_store %arg6[%c0_8, %c0_9, %c0_10], %12 {strides = array<i32>} : memref<1x8x256xf32, #tpu.memory_space<vmem>>, vector<1x8x256xf32>,
    return
  }
  func.func @transform_0(%arg0: i32, %arg1: i32, %arg2: i32) -> (i32, i32, i32) {
    %c0_i32 = arith.constant 0 : i32
    return %arg0, %arg1, %arg2 : i32, i32, i32
  }
  func.func @transform_1(%arg0: i32, %arg1: i32, %arg2: i32) -> (i32, i32, i32) {
    %c0_i32 = arith.constant 0 : i32
    %c0_i32_0 = arith.constant 0 : i32
    return %arg0, %arg1, %c0_i32 : i32, i32, i32
  }
  func.func @transform_2(%arg0: i32, %arg1: i32, %arg2: i32) -> (i32, i32, i32) {
    %c0_i32 = arith.constant 0 : i32
    %c0_i32_0 = arith.constant 0 : i32
    return %arg0, %arg1, %c0_i32 : i32, i32, i32
  }
  func.func @transform_3(%arg0: i32, %arg1: i32, %arg2: i32) -> (i32, i32, i32) {
    %c0_i32 = arith.constant 0 : i32
    return %arg0, %arg1, %arg2 : i32, i32, i32
  }
}

</mosaic_0001>

<bundles_post_ra>
// kernel: custom-call.1
= control target key start
LH: loop header
LB: loop body
LE: loop exit
PB: predicated region body
PF: predicated region fallthrough
CT: control target
= control target key end

     0   :  { %s56_s0 = inlined_call_operand.hbm [shape: c64[2,4,4,8,8], index: 0, kind: input, shape index: {}]   ;;  %s57_s1 = inlined_call_operand.vmem [shape: f32[2,4,4,8,8], index: 1, kind: output, shape index: {}]  }
   0x1   :  { %s2_s8 = scalar_lea.hbm %s56_s0, 256 }
   0x2   :  { %3 = vsyncpa [#allocation0], 0  ;;  %s5_s9 = sshll.u32 %s2_s8, 4  ;;  %s7_s12 = sshll.u32 %s57_s1, 4  ;;  %s6_s9 = int_to_ptr.hbm [resolvable:$true] %s5_s9  ;;  %s8_s12 = int_to_ptr.vmem [resolvable:$true] %s7_s12 }
   0x3   :  { %10 = dma.hbm_to_vmem [thread:$0]  %s6_s9, 4096, %s8_s12, [#allocation0] }
   0x4   :  { %38 = dma.done.wait [#allocation0], 4096  }
   0x5   :  { %39 = vsyncadd [#allocation0], 4294963200 }
   0x6   :  { %13 = vsyncpa [#allocation0], 1 }

// kernel: custom-call
= control target key start
LH: loop header
LB: loop body
LE: loop exit
PB: predicated region body
PF: predicated region fallthrough
CT: control target
= control target key end

     0   :  { %2 = vsyncpa [#allocation0], 0  ;;  %s55_s0 = inlined_call_operand.hbm [shape: c64[2,4,4,8,8], index: 0, kind: input, shape index: {}]   ;;  %s56_s1 = inlined_call_operand.vmem [shape: f32[2,4,4,8,8], index: 1, kind: output, shape index: {}]  }
   0x1   :  { %s4_s8 = sshll.u32 %s55_s0, 4  ;;  %s6_s11 = sshll.u32 %s56_s1, 4  ;;  %s5_s8 = int_to_ptr.hbm [resolvable:$true] %s4_s8  ;;  %s7_s11 = int_to_ptr.vmem [resolvable:$true] %s6_s11 }
   0x2   :  { %9 = dma.hbm_to_vmem [thread:$0]  %s5_s8, 4096, %s7_s11, [#allocation0] }
   0x3   :  { %37 = dma.done.wait [#allocation0], 4096  }
   0x4   :  { %38 = vsyncadd [#allocation0], 4294963200 }
   0x5   :  { %12 = vsyncpa [#allocation0], 1 }

// kernel: custom-call.2
= control target key start
LH: loop header
LB: loop body
LE: loop exit
PB: predicated region body
PF: predicated region fallthrough
CT: control target
= control target key end

     0   :  { %s105_s0 = inlined_call_operand.vmem [shape: f32[2,4,4,8,8], index: 0, kind: input, shape index: {}]   ;;  %s106_s1 = inlined_call_operand.vmem [shape: f32[2,4,4,8,8], index: 1, kind: input, shape index: {}]   ;;  %s107_s2 = inlined_call_operand.hbm [shape: c64[2,4,4,8,8], index: 2, kind: output, shape index: {}]  }
   0x1   :  { %s3_s11 = scalar_lea.hbm %s107_s2, 256 }
   0x2   :  { %4 = vsyncpa [#allocation0], 0  ;;  %s6_s14 = sshll.u32 %s105_s0, 4  ;;  %s8_s17 = sshll.u32 %s107_s2, 4  ;;  %s7_s14 = int_to_ptr.vmem [resolvable:$true] %s6_s14  ;;  %s9_s17 = int_to_ptr.hbm [resolvable:$true] %s8_s17 }
   0x3   :  { %11 = dma.vmem_to_hbm [thread:$0]  %s7_s14, 4096, %s9_s17, [#allocation0] }
   0x4   :  { %74 = dma.done.wait [#allocation0], 4096  }
   0x5   :  { %75 = vsyncadd [#allocation0], 4294963200 }
   0x6   :  { %14 = vsyncpa [#allocation0], 1 }
   0x7   :  { %15 = vsyncpa [#allocation1], 0  ;;  %s17_s20 = sshll.u32 %s106_s1, 4  ;;  %s19_s21 = sshll.u32 %s3_s11, 4  ;;  %s18_s20 = int_to_ptr.vmem [resolvable:$true] %s17_s20  ;;  %s20_s21 = int_to_ptr.hbm [resolvable:$true] %s19_s21 }
   0x8   :  { %22 = dma.vmem_to_hbm [thread:$0]  %s18_s20, 4096, %s20_s21, [#allocation1] }
   0x9   :  { %76 = dma.done.wait [#allocation1], 4096  }
   0xa   :  { %77 = vsyncadd [#allocation1], 4294963200 }
   0xb   :  { %25 = vsyncpa [#allocation1], 1 }

// kernel: squeeze.3
= control target key start
LH: loop header
LB: loop body
LE: loop exit
PB: predicated region body
PF: predicated region fallthrough
CT: control target
= control target key end

     0   :  { %s579_s8 = smov 112   ;;  %s580_s9 = smov 120   ;;  %vm3_vm0 = vcmask 64512   ;;  %s1160_s0 = inlined_call_operand.vmem [shape: f32[1,8,256], index: 0, kind: input, shape index: {}]   ;;  %s1161_s1 = inlined_call_operand.vmem [shape: f32[2,4,4,8,8], index: 1, kind: output, shape index: {}]  }
   0x1   :  { %v63_v0 = vld.sshfl [vmem:[%s1160_s0] sm:$0xff pattern:$0xb3a29180]   ;;  %s581_s10 = smov 104   ;;  %s582_s13 = smov 96  }
   0x2   :  { %64 = vrot.lane.b32.xlu1 %v63_v0, %s579_s8  ;;  %39 = vrot.lane.b32.xlu0 %v63_v0, %s580_s9  ;;  %v442_v1 = vld.sshfl [vmem:[%s1160_s0 + $0x4] sm:$0xff pattern:$0xb3a29180]   ;;  %s583_s14 = smov 88   ;;  %s584_s15 = smov 80  }
   0x3   :  { %89 = vrot.lane.b32.xlu2 %v63_v0, %s581_s10  ;;  %s585_s16 = smov 72   ;;  %s586_s17 = smov 64   ;;  %v2_v32 = vld [vmem:[%s1160_s0] sm:$0xff]   ;;  %v420_v33 = vld [vmem:[%s1160_s0 + $0x8] sm:$0xff]  }
   0x4   :  { %s587_s18 = smov 56   ;;  %s588_s19 = smov 48   ;;  %4 = vst.msk [vmem:[%s1161_s1] sm:$0x1] %vm3_vm0, %v2_v32  }
   0x5   :  { %s589_s20 = smov 40   ;;  %s590_s21 = smov 32   ;;  %413 = vst.msk [vmem:[%s1161_s1 + $0x1f] sm:$0x2] %vm3_vm0, %v2_v32  }
   0x6   :  { %s591_s22 = smov 24   ;;  %s592_s23 = smov 16   ;;  %414 = vst.msk [vmem:[%s1161_s1 + $0x3e] sm:$0x4] %vm3_vm0, %v2_v32  }
   0x7   :  { %s593_s24 = smov 8   ;;  %415 = vst.msk [vmem:[%s1161_s1 + $0x5d] sm:$0x8] %vm3_vm0, %v2_v32  }
   0x8   :  { %416 = vst.msk [vmem:[%s1161_s1 + $0x7c] sm:$0x10] %vm3_vm0, %v2_v32  }
   0x9   :  { %417 = vst.msk [vmem:[%s1161_s1 + $0x9b] sm:$0x20] %vm3_vm0, %v2_v32  }
   0xa   :  { %77 = vrot.lane.b32.xlu1 %v442_v1, %s579_s8  ;;  %52 = vrot.lane.b32.xlu0 %v442_v1, %s580_s9  ;;  %418 = vst.msk [vmem:[%s1161_s1 + $0xba] sm:$0x40] %vm3_vm0, %v2_v32  }
   0xb   :  { %102 = vrot.lane.b32.xlu2 %v442_v1, %s581_s10  ;;  %419 = vst.msk [vmem:[%s1161_s1 + $0xd9] sm:$0x80] %vm3_vm0, %v2_v32  }
   0xc   :  { %421 = vst.msk [vmem:[%s1161_s1 + $0x10] sm:$0x1] %vm3_vm0, %v420_v33  }
   0xd   :  { %422 = vst.msk [vmem:[%s1161_s1 + $0x2f] sm:$0x2] %vm3_vm0, %v420_v33  }
   0xe   :  { %423 = vst.msk [vmem:[%s1161_s1 + $0x4e] sm:$0x4] %vm3_vm0, %v420_v33  }
   0xf   :  { %424 = vst.msk [vmem:[%s1161_s1 + $0x6d] sm:$0x8] %vm3_vm0, %v420_v33  }
  0x10   :  { %425 = vst.msk [vmem:[%s1161_s1 + $0x8c] sm:$0x10] %vm3_vm0, %v420_v33  }
  0x11   :  { %426 = vst.msk [vmem:[%s1161_s1 + $0xab] sm:$0x20] %vm3_vm0, %v420_v33  }
  0x12   :  { %127 = vrot.lane.b32.xlu1 %v442_v1, %s582_s13  ;;  %114 = vrot.lane.b32.xlu0 %v63_v0, %s582_s13  ;;  %427 = vst.msk [vmem:[%s1161_s1 + $0xca] sm:$0x40] %vm3_vm0, %v420_v33  }
  0x13   :  { %139 = vrot.lane.b32.xlu2 %v63_v0, %s583_s14  ;;  %428 = vst.msk [vmem:[%s1161_s1 + $0xe9] sm:$0x80] %vm3_vm0, %v420_v33  }
  0x1a   :  { %164 = vrot.lane.b32.xlu1 %v63_v0, %s584_s15  ;;  %152 = vrot.lane.b32.xlu0 %v442_v1, %s583_s14 }
  0x1b   :  { %177 = vrot.lane.b32.xlu2 %v442_v1, %s584_s15 }
  0x22   :  { %202 = vrot.lane.b32.xlu1 %v442_v1, %s585_s16  ;;  %189 = vrot.lane.b32.xlu0 %v63_v0, %s585_s16 }
  0x23   :  { %214 = vrot.lane.b32.xlu2 %v63_v0, %s586_s17 }
  0x2a   :  { %239 = vrot.lane.b32.xlu1 %v63_v0, %s587_s18  ;;  %227 = vrot.lane.b32.xlu0 %v442_v1, %s586_s17 }
  0x2b   :  { %252 = vrot.lane.b32.xlu2 %v442_v1, %s587_s18 }
  0x32   :  { %277 = vrot.lane.b32.xlu1 %v442_v1, %s588_s19  ;;  %264 = vrot.lane.b32.xlu0 %v63_v0, %s588_s19 }
  0x33   :  { %289 = vrot.lane.b32.xlu2 %v63_v0, %s589_s20 }
  0x3a   :  { %314 = vrot.lane.b32.xlu1 %v63_v0, %s590_s21  ;;  %302 = vrot.lane.b32.xlu0 %v442_v1, %s589_s20 }
  0x3b   :  { %327 = vrot.lane.b32.xlu2 %v442_v1, %s590_s21 }
  0x42   :  { %352 = vrot.lane.b32.xlu1 %v442_v1, %s591_s22  ;;  %339 = vrot.lane.b32.xlu0 %v63_v0, %s591_s22 }
  0x43   :  { %364 = vrot.lane.b32.xlu2 %v63_v0, %s592_s23 }
  0x4a   :  { %389 = vrot.lane.b32.xlu1 %v63_v0, %s593_s24  ;;  %377 = vrot.lane.b32.xlu0 %v442_v1, %s592_s23 }
  0x4b   :  { %402 = vrot.lane.b32.xlu2 %v442_v1, %s593_s24 }
  0x5d   :  { %v90_v2 = vpop.permute.xlu2 %89  }
  0x5e   :  { %447 = vst.msk [vmem:[%s1161_s1 + $0x3] ss:$16 sm:$0x3] %vm3_vm0, %v90_v2  }
  0x5f   :  { %448 = vst.msk [vmem:[%s1161_s1 + $0x3] ss:$16 sm:$0xc] %vm3_vm0, %v90_v2  }
  0x60   :  { %449 = vst.msk [vmem:[%s1161_s1 + $0x3] ss:$16 sm:$0x30] %vm3_vm0, %v90_v2  }
  0x61   :  { %450 = vst.msk [vmem:[%s1161_s1 + $0x3] ss:$16 sm:$0xc0] %vm3_vm0, %v90_v2  }
  0x65   :  { %v103_v3 = vpop.permute.xlu2 %102  }
  0x66   :  { %452 = vst.msk [vmem:[%s1161_s1 + $0x83] ss:$16 sm:$0x3] %vm3_vm0, %v103_v3  }
  0x67   :  { %453 = vst.msk [vmem:[%s1161_s1 + $0x83] ss:$16 sm:$0xc] %vm3_vm0, %v103_v3  }
  0x68   :  { %454 = vst.msk [vmem:[%s1161_s1 + $0x83] ss:$16 sm:$0x30] %vm3_vm0, %v103_v3  }
  0x69   :  { %455 = vst.msk [vmem:[%s1161_s1 + $0x83] ss:$16 sm:$0xc0] %vm3_vm0, %v103_v3  }
  0x6d   :  { %v140_v4 = vpop.permute.xlu2 %139  }
  0x6e   :  { %465 = vst.msk [vmem:[%s1161_s1 + $0x5] ss:$16 sm:$0x3] %vm3_vm0, %v140_v4  }
  0x6f   :  { %466 = vst.msk [vmem:[%s1161_s1 + $0x5] ss:$16 sm:$0xc] %vm3_vm0, %v140_v4  }
  0x70   :  { %467 = vst.msk [vmem:[%s1161_s1 + $0x5] ss:$16 sm:$0x30] %vm3_vm0, %v140_v4  }
  0x71   :  { %468 = vst.msk [vmem:[%s1161_s1 + $0x5] ss:$16 sm:$0xc0] %vm3_vm0, %v140_v4  }
  0x74   :  { %v65_v5 = vpop.permute.xlu1 %64   ;;  %v40_v6 = vpop.permute.xlu0 %39  }
  0x75   :  { %438 = vst.msk [vmem:[%s1161_s1 + $0x2] ss:$16 sm:$0x3] %vm3_vm0, %v65_v5   ;;  %v178_v7 = vpop.permute.xlu2 %177  }
  0x76   :  { %439 = vst.msk [vmem:[%s1161_s1 + $0x2] ss:$16 sm:$0xc] %vm3_vm0, %v65_v5  }
  0x77   :  { %440 = vst.msk [vmem:[%s1161_s1 + $0x2] ss:$16 sm:$0x30] %vm3_vm0, %v65_v5  }
  0x78   :  { %441 = vst.msk [vmem:[%s1161_s1 + $0x2] ss:$16 sm:$0xc0] %vm3_vm0, %v65_v5  }
  0x79   :  { %429 = vst.msk [vmem:[%s1161_s1 + $0x1] ss:$16 sm:$0x3] %vm3_vm0, %v40_v6  }
  0x7a   :  { %430 = vst.msk [vmem:[%s1161_s1 + $0x1] ss:$16 sm:$0xc] %vm3_vm0, %v40_v6  }
  0x7b   :  { %431 = vst.msk [vmem:[%s1161_s1 + $0x1] ss:$16 sm:$0x30] %vm3_vm0, %v40_v6  }
  0x7c   :  { %432 = vst.msk [vmem:[%s1161_s1 + $0x1] ss:$16 sm:$0xc0] %vm3_vm0, %v40_v6   ;;  %v78_v8 = vpop.permute.xlu1 %77   ;;  %v53_v9 = vpop.permute.xlu0 %52  }
  0x7d   :  { %443 = vst.msk [vmem:[%s1161_s1 + $0x82] ss:$16 sm:$0x3] %vm3_vm0, %v78_v8   ;;  %v215_v10 = vpop.permute.xlu2 %214  }
  0x7e   :  { %444 = vst.msk [vmem:[%s1161_s1 + $0x82] ss:$16 sm:$0xc] %vm3_vm0, %v78_v8  }
  0x7f   :  { %445 = vst.msk [vmem:[%s1161_s1 + $0x82] ss:$16 sm:$0x30] %vm3_vm0, %v78_v8  }
  0x80   :  { %446 = vst.msk [vmem:[%s1161_s1 + $0x82] ss:$16 sm:$0xc0] %vm3_vm0, %v78_v8  }
  0x81   :  { %434 = vst.msk [vmem:[%s1161_s1 + $0x81] ss:$16 sm:$0x3] %vm3_vm0, %v53_v9  }
  0x82   :  { %435 = vst.msk [vmem:[%s1161_s1 + $0x81] ss:$16 sm:$0xc] %vm3_vm0, %v53_v9  }
  0x83   :  { %436 = vst.msk [vmem:[%s1161_s1 + $0x81] ss:$16 sm:$0x30] %vm3_vm0, %v53_v9  }
  0x84   :  { %437 = vst.msk [vmem:[%s1161_s1 + $0x81] ss:$16 sm:$0xc0] %vm3_vm0, %v53_v9   ;;  %v128_v11 = vpop.permute.xlu1 %127   ;;  %v115_v12 = vpop.permute.xlu0 %114  }
  0x85   :  { %461 = vst.msk [vmem:[%s1161_s1 + $0x84] ss:$16 sm:$0x3] %vm3_vm0, %v128_v11   ;;  %v253_v13 = vpop.permute.xlu2 %252  }
  0x86   :  { %462 = vst.msk [vmem:[%s1161_s1 + $0x84] ss:$16 sm:$0xc] %vm3_vm0, %v128_v11  }
  0x87   :  { %463 = vst.msk [vmem:[%s1161_s1 + $0x84] ss:$16 sm:$0x30] %vm3_vm0, %v128_v11  }
  0x88   :  { %464 = vst.msk [vmem:[%s1161_s1 + $0x84] ss:$16 sm:$0xc0] %vm3_vm0, %v128_v11  }
  0x89   :  { %456 = vst.msk [vmem:[%s1161_s1 + $0x4] ss:$16 sm:$0x3] %vm3_vm0, %v115_v12  }
  0x8a   :  { %457 = vst.msk [vmem:[%s1161_s1 + $0x4] ss:$16 sm:$0xc] %vm3_vm0, %v115_v12  }
  0x8b   :  { %458 = vst.msk [vmem:[%s1161_s1 + $0x4] ss:$16 sm:$0x30] %vm3_vm0, %v115_v12  }
  0x8c   :  { %459 = vst.msk [vmem:[%s1161_s1 + $0x4] ss:$16 sm:$0xc0] %vm3_vm0, %v115_v12   ;;  %v165_v14 = vpop.permute.xlu1 %164   ;;  %v153_v15 = vpop.permute.xlu0 %152  }
  0x8d   :  { %479 = vst.msk [vmem:[%s1161_s1 + $0x86] ss:$16 sm:$0x3] %vm3_vm0, %v178_v7   ;;  %v290_v16 = vpop.permute.xlu2 %289  }
  0x8e   :  { %480 = vst.msk [vmem:[%s1161_s1 + $0x86] ss:$16 sm:$0xc] %vm3_vm0, %v178_v7  }
  0x8f   :  { %481 = vst.msk [vmem:[%s1161_s1 + $0x86] ss:$16 sm:$0x30] %vm3_vm0, %v178_v7  }
  0x90   :  { %482 = vst.msk [vmem:[%s1161_s1 + $0x86] ss:$16 sm:$0xc0] %vm3_vm0, %v178_v7  }
  0x91   :  { %474 = vst.msk [vmem:[%s1161_s1 + $0x6] ss:$16 sm:$0x3] %vm3_vm0, %v165_v14  }
  0x92   :  { %475 = vst.msk [vmem:[%s1161_s1 + $0x6] ss:$16 sm:$0xc] %vm3_vm0, %v165_v14  }
  0x93   :  { %476 = vst.msk [vmem:[%s1161_s1 + $0x6] ss:$16 sm:$0x30] %vm3_vm0, %v165_v14  }
  0x94   :  { %477 = vst.msk [vmem:[%s1161_s1 + $0x6] ss:$16 sm:$0xc0] %vm3_vm0, %v165_v14   ;;  %v203_v17 = vpop.permute.xlu1 %202   ;;  %v190_v18 = vpop.permute.xlu0 %189  }
  0x95   :  { %470 = vst.msk [vmem:[%s1161_s1 + $0x85] ss:$16 sm:$0x3] %vm3_vm0, %v153_v15   ;;  %v328_v21 = vpop.permute.xlu2 %327  }
  0x96   :  { %471 = vst.msk [vmem:[%s1161_s1 + $0x85] ss:$16 sm:$0xc] %vm3_vm0, %v153_v15  }
  0x97   :  { %472 = vst.msk [vmem:[%s1161_s1 + $0x85] ss:$16 sm:$0x30] %vm3_vm0, %v153_v15  }
  0x98   :  { %473 = vst.msk [vmem:[%s1161_s1 + $0x85] ss:$16 sm:$0xc0] %vm3_vm0, %v153_v15  }
  0x99   :  { %492 = vst.msk [vmem:[%s1161_s1 + $0x8] ss:$16 sm:$0x3] %vm3_vm0, %v215_v10  }
  0x9a   :  { %493 = vst.msk [vmem:[%s1161_s1 + $0x8] ss:$16 sm:$0xc] %vm3_vm0, %v215_v10  }
  0x9b   :  { %494 = vst.msk [vmem:[%s1161_s1 + $0x8] ss:$16 sm:$0x30] %vm3_vm0, %v215_v10  }
  0x9c   :  { %495 = vst.msk [vmem:[%s1161_s1 + $0x8] ss:$16 sm:$0xc0] %vm3_vm0, %v215_v10   ;;  %v240_v19 = vpop.permute.xlu1 %239   ;;  %v228_v20 = vpop.permute.xlu0 %227  }
  0x9d   :  { %488 = vst.msk [vmem:[%s1161_s1 + $0x87] ss:$16 sm:$0x3] %vm3_vm0, %v203_v17   ;;  %v365_v24 = vpop.permute.xlu2 %364  }
  0x9e   :  { %489 = vst.msk [vmem:[%s1161_s1 + $0x87] ss:$16 sm:$0xc] %vm3_vm0, %v203_v17  }
  0x9f   :  { %490 = vst.msk [vmem:[%s1161_s1 + $0x87] ss:$16 sm:$0x30] %vm3_vm0, %v203_v17  }
  0xa0   :  { %491 = vst.msk [vmem:[%s1161_s1 + $0x87] ss:$16 sm:$0xc0] %vm3_vm0, %v203_v17  }
  0xa1   :  { %483 = vst.msk [vmem:[%s1161_s1 + $0x7] ss:$16 sm:$0x3] %vm3_vm0, %v190_v18  }
  0xa2   :  { %484 = vst.msk [vmem:[%s1161_s1 + $0x7] ss:$16 sm:$0xc] %vm3_vm0, %v190_v18  }
  0xa3   :  { %485 = vst.msk [vmem:[%s1161_s1 + $0x7] ss:$16 sm:$0x30] %vm3_vm0, %v190_v18  }
  0xa4   :  { %486 = vst.msk [vmem:[%s1161_s1 + $0x7] ss:$16 sm:$0xc0] %vm3_vm0, %v190_v18   ;;  %v278_v22 = vpop.permute.xlu1 %277   ;;  %v265_v23 = vpop.permute.xlu0 %264  }
  0xa5   :  { %506 = vst.msk [vmem:[%s1161_s1 + $0x89] ss:$16 sm:$0x3] %vm3_vm0, %v253_v13   ;;  %v403_v29 = vpop.permute.xlu2 %402  }
  0xa6   :  { %507 = vst.msk [vmem:[%s1161_s1 + $0x89] ss:$16 sm:$0xc] %vm3_vm0, %v253_v13  }
  0xa7   :  { %508 = vst.msk [vmem:[%s1161_s1 + $0x89] ss:$16 sm:$0x30] %vm3_vm0, %v253_v13  }
  0xa8   :  { %509 = vst.msk [vmem:[%s1161_s1 + $0x89] ss:$16 sm:$0xc0] %vm3_vm0, %v253_v13  }
  0xa9   :  { %501 = vst.msk [vmem:[%s1161_s1 + $0x9] ss:$16 sm:$0x3] %vm3_vm0, %v240_v19  }
  0xaa   :  { %502 = vst.msk [vmem:[%s1161_s1 + $0x9] ss:$16 sm:$0xc] %vm3_vm0, %v240_v19  }
  0xab   :  { %503 = vst.msk [vmem:[%s1161_s1 + $0x9] ss:$16 sm:$0x30] %vm3_vm0, %v240_v19  }
  0xac   :  { %504 = vst.msk [vmem:[%s1161_s1 + $0x9] ss:$16 sm:$0xc0] %vm3_vm0, %v240_v19   ;;  %v315_v25 = vpop.permute.xlu1 %314   ;;  %v303_v26 = vpop.permute.xlu0 %302  }
  0xad   :  { %497 = vst.msk [vmem:[%s1161_s1 + $0x88] ss:$16 sm:$0x3] %vm3_vm0, %v228_v20  }
  0xae   :  { %498 = vst.msk [vmem:[%s1161_s1 + $0x88] ss:$16 sm:$0xc] %vm3_vm0, %v228_v20  }
  0xaf   :  { %499 = vst.msk [vmem:[%s1161_s1 + $0x88] ss:$16 sm:$0x30] %vm3_vm0, %v228_v20  }
  0xb0   :  { %500 = vst.msk [vmem:[%s1161_s1 + $0x88] ss:$16 sm:$0xc0] %vm3_vm0, %v228_v20  }
  0xb1   :  { %519 = vst.msk [vmem:[%s1161_s1 + $0xb] ss:$16 sm:$0x3] %vm3_vm0, %v290_v16  }
  0xb2   :  { %520 = vst.msk [vmem:[%s1161_s1 + $0xb] ss:$16 sm:$0xc] %vm3_vm0, %v290_v16  }
  0xb3   :  { %521 = vst.msk [vmem:[%s1161_s1 + $0xb] ss:$16 sm:$0x30] %vm3_vm0, %v290_v16  }
  0xb4   :  { %522 = vst.msk [vmem:[%s1161_s1 + $0xb] ss:$16 sm:$0xc0] %vm3_vm0, %v290_v16   ;;  %v353_v27 = vpop.permute.xlu1 %352   ;;  %v340_v28 = vpop.permute.xlu0 %339  }
  0xb5   :  { %515 = vst.msk [vmem:[%s1161_s1 + $0x8a] ss:$16 sm:$0x3] %vm3_vm0, %v278_v22  }
  0xb6   :  { %516 = vst.msk [vmem:[%s1161_s1 + $0x8a] ss:$16 sm:$0xc] %vm3_vm0, %v278_v22  }
  0xb7   :  { %517 = vst.msk [vmem:[%s1161_s1 + $0x8a] ss:$16 sm:$0x30] %vm3_vm0, %v278_v22  }
  0xb8   :  { %518 = vst.msk [vmem:[%s1161_s1 + $0x8a] ss:$16 sm:$0xc0] %vm3_vm0, %v278_v22  }
  0xb9   :  { %510 = vst.msk [vmem:[%s1161_s1 + $0xa] ss:$16 sm:$0x3] %vm3_vm0, %v265_v23  }
  0xba   :  { %511 = vst.msk [vmem:[%s1161_s1 + $0xa] ss:$16 sm:$0xc] %vm3_vm0, %v265_v23  }
  0xbb   :  { %512 = vst.msk [vmem:[%s1161_s1 + $0xa] ss:$16 sm:$0x30] %vm3_vm0, %v265_v23  }
  0xbc   :  { %513 = vst.msk [vmem:[%s1161_s1 + $0xa] ss:$16 sm:$0xc0] %vm3_vm0, %v265_v23   ;;  %v390_v30 = vpop.permute.xlu1 %389   ;;  %v378_v31 = vpop.permute.xlu0 %377  }
  0xbd   :  { %533 = vst.msk [vmem:[%s1161_s1 + $0x8c] ss:$16 sm:$0x3] %vm3_vm0, %v328_v21  }
  0xbe   :  { %534 = vst.msk [vmem:[%s1161_s1 + $0x8c] ss:$16 sm:$0xc] %vm3_vm0, %v328_v21  }
  0xbf   :  { %535 = vst.msk [vmem:[%s1161_s1 + $0x8c] ss:$16 sm:$0x30] %vm3_vm0, %v328_v21  }
  0xc0   :  { %536 = vst.msk [vmem:[%s1161_s1 + $0x8c] ss:$16 sm:$0xc0] %vm3_vm0, %v328_v21  }
  0xc1   :  { %528 = vst.msk [vmem:[%s1161_s1 + $0xc] ss:$16 sm:$0x3] %vm3_vm0, %v315_v25  }
  0xc2   :  { %529 = vst.msk [vmem:[%s1161_s1 + $0xc] ss:$16 sm:$0xc] %vm3_vm0, %v315_v25  }
  0xc3   :  { %530 = vst.msk [vmem:[%s1161_s1 + $0xc] ss:$16 sm:$0x30] %vm3_vm0, %v315_v25  }
  0xc4   :  { %531 = vst.msk [vmem:[%s1161_s1 + $0xc] ss:$16 sm:$0xc0] %vm3_vm0, %v315_v25  }
  0xc5   :  { %524 = vst.msk [vmem:[%s1161_s1 + $0x8b] ss:$16 sm:$0x3] %vm3_vm0, %v303_v26  }
  0xc6   :  { %525 = vst.msk [vmem:[%s1161_s1 + $0x8b] ss:$16 sm:$0xc] %vm3_vm0, %v303_v26  }
  0xc7   :  { %526 = vst.msk [vmem:[%s1161_s1 + $0x8b] ss:$16 sm:$0x30] %vm3_vm0, %v303_v26  }
  0xc8   :  { %527 = vst.msk [vmem:[%s1161_s1 + $0x8b] ss:$16 sm:$0xc0] %vm3_vm0, %v303_v26  }
  0xc9   :  { %546 = vst.msk [vmem:[%s1161_s1 + $0xe] ss:$16 sm:$0x3] %vm3_vm0, %v365_v24  }
  0xca   :  { %547 = vst.msk [vmem:[%s1161_s1 + $0xe] ss:$16 sm:$0xc] %vm3_vm0, %v365_v24  }
  0xcb   :  { %548 = vst.msk [vmem:[%s1161_s1 + $0xe] ss:$16 sm:$0x30] %vm3_vm0, %v365_v24  }
  0xcc   :  { %549 = vst.msk [vmem:[%s1161_s1 + $0xe] ss:$16 sm:$0xc0] %vm3_vm0, %v365_v24  }
  0xcd   :  { %542 = vst.msk [vmem:[%s1161_s1 + $0x8d] ss:$16 sm:$0x3] %vm3_vm0, %v353_v27  }
  0xce   :  { %543 = vst.msk [vmem:[%s1161_s1 + $0x8d] ss:$16 sm:$0xc] %vm3_vm0, %v353_v27  }
  0xcf   :  { %544 = vst.msk [vmem:[%s1161_s1 + $0x8d] ss:$16 sm:$0x30] %vm3_vm0, %v353_v27  }
  0xd0   :  { %545 = vst.msk [vmem:[%s1161_s1 + $0x8d] ss:$16 sm:$0xc0] %vm3_vm0, %v353_v27  }
  0xd1   :  { %537 = vst.msk [vmem:[%s1161_s1 + $0xd] ss:$16 sm:$0x3] %vm3_vm0, %v340_v28  }
  0xd2   :  { %538 = vst.msk [vmem:[%s1161_s1 + $0xd] ss:$16 sm:$0xc] %vm3_vm0, %v340_v28  }
  0xd3   :  { %539 = vst.msk [vmem:[%s1161_s1 + $0xd] ss:$16 sm:$0x30] %vm3_vm0, %v340_v28  }
  0xd4   :  { %540 = vst.msk [vmem:[%s1161_s1 + $0xd] ss:$16 sm:$0xc0] %vm3_vm0, %v340_v28  }
  0xd5   :  { %560 = vst.msk [vmem:[%s1161_s1 + $0x8f] ss:$16 sm:$0x3] %vm3_vm0, %v403_v29  }
  0xd6   :  { %561 = vst.msk [vmem:[%s1161_s1 + $0x8f] ss:$16 sm:$0xc] %vm3_vm0, %v403_v29  }
  0xd7   :  { %562 = vst.msk [vmem:[%s1161_s1 + $0x8f] ss:$16 sm:$0x30] %vm3_vm0, %v403_v29  }
  0xd8   :  { %563 = vst.msk [vmem:[%s1161_s1 + $0x8f] ss:$16 sm:$0xc0] %vm3_vm0, %v403_v29  }
  0xd9   :  { %555 = vst.msk [vmem:[%s1161_s1 + $0xf] ss:$16 sm:$0x3] %vm3_vm0, %v390_v30  }
  0xda   :  { %556 = vst.msk [vmem:[%s1161_s1 + $0xf] ss:$16 sm:$0xc] %vm3_vm0, %v390_v30  }
  0xdb   :  { %557 = vst.msk [vmem:[%s1161_s1 + $0xf] ss:$16 sm:$0x30] %vm3_vm0, %v390_v30  }
  0xdc   :  { %558 = vst.msk [vmem:[%s1161_s1 + $0xf] ss:$16 sm:$0xc0] %vm3_vm0, %v390_v30  }
  0xdd   :  { %551 = vst.msk [vmem:[%s1161_s1 + $0x8e] ss:$16 sm:$0x3] %vm3_vm0, %v378_v31  }
  0xde   :  { %552 = vst.msk [vmem:[%s1161_s1 + $0x8e] ss:$16 sm:$0xc] %vm3_vm0, %v378_v31  }
  0xdf   :  { %553 = vst.msk [vmem:[%s1161_s1 + $0x8e] ss:$16 sm:$0x30] %vm3_vm0, %v378_v31  }
  0xe0   :  { %554 = vst.msk [vmem:[%s1161_s1 + $0x8e] ss:$16 sm:$0xc0] %vm3_vm0, %v378_v31  }

// kernel: complex_batchnorm3d.2
= control target key start
LH: loop header
LB: loop body
LE: loop exit
PB: predicated region body
PF: predicated region fallthrough
CT: control target
= control target key end

     0   :  { %s446_s9 = smov 0   ;;  %s448_s10 = smov 0   ;;  %s486_s0 = inlined_call_operand.vmem [shape: f32[2,8,256], index: 0, kind: input, shape index: {}]   ;;  %s487_s1 = inlined_call_operand.vmem [shape: f32[2,8,1], index: 1, kind: output, shape index: {0}]   ;;  %s488_s2 = inlined_call_operand.vmem [shape: f32[2,8,1], index: 2, kind: output, shape index: {1}]  }
   0x1   :  { %s450_s11 = smov 0  }
   0x2 LB: > { %s32_s12 = sadd.s32 1, %s424_s10  ;;  %p373_p0 = scmp.ge.s32.totalorder %s428_s11, 1  ;;  %s428_s11 = sphi %s450_s11, %s13_s11   ;;  %s424_s10 = sphi %s448_s10, %s490_s10   ;;  %s420_s9 = sphi %s446_s9, %s489_s9  }
   0x3   : > { %p34_p1 = scmp.ge.s32.totalorder %s32_s12, 2  ;;  %p151_p2 = scmp.lt.s32.totalorder %s428_s11, 3 }
   0x5   : > { %s492_s12 = smov (%p34_p1, %s32_s12), 0  ;;  %p152_p3 = pnand %p373_p0, %p151_p2 }
   0x6   : > { %p191_p4 = scmp.lt.s32.totalorder (!%p152_p3), %s420_s9, 1 }
   0x7   : > { %155 = sbr.rel (%p152_p3) target bundleno = 145 (0x91), region = 24 }
   0xc   : > { %s494_s9 = smov (!%p191_p4, %s420_s9), 1  ;;  %vm222_vm0 = vcmask 7168   ;;  %v430_v2 = vmov 0.0  }
   0xd   : > { %s380_s13 = sshll.u32 %s494_s9, 4  ;;  %s376_s14 = sshll.u32 %s494_s9, 3 }
   0xe   : > { %s202_s17 = scalar_lea.vmem %s486_s0, %s380_s13  ;;  %s210_s20 = scalar_lea.vmem %s487_s1, %s376_s14 }
   0xf   : > { %v225_v0 = vld [vmem:[%s202_s17] sm:$0xff]  ;;  %v226_v1 = vld [vmem:[%s202_s17 + $0x8] sm:$0xff]  ;;  %223 = vst.msk [vmem:[%s210_s20] sm:$0xff] %vm222_vm0, %v430_v2  ;;  %s217_s23 = scalar_lea.vmem %s488_s2, %s376_s14 }
  0x10   : > { %v228_v3 = vadd.f32 %v226_v1, %v225_v0  ;;  %224 = vst.msk [vmem:[%s217_s23] sm:$0xff] %vm222_vm0, %v430_v2  ;;  %v235_v4 = vmul.f32 %v225_v0, %v225_v0  ;;  %v236_v5 = vmul.f32 %v226_v1, %v226_v1 }
  0x12   : > { %229 = vadd.xlane.f32.xlu0 %v228_v3  ;;  %v237_v6 = vadd.f32 %v236_v5, %v235_v4 }
  0x16   : > { %v227_v7 = vld [vmem:[%s210_s20] sm:$0xff] }
  0x17   : > { %v234_v10 = vld [vmem:[%s217_s23] sm:$0xff] }
  0x1a   : > { %238 = vadd.xlane.f32.xlu0 %v237_v6 }
  0x85   : > { %v230_v8 = vpop.xlane.xlu0 %229 }
  0x86   : > { %v231_v9 = vadd.f32 %v230_v8, %v227_v7 }
  0x88   : > { %233 = vst.msk [vmem:[%s210_s20] sm:$0xff] %vm222_vm0, %v231_v9 }
  0x8d   : > { %v239_v11 = vpop.xlane.xlu0 %238 }
  0x8e   : > { %v240_v12 = vadd.f32 %v239_v11, %v234_v10 }
  0x90   : > { %241 = vst.msk [vmem:[%s217_s23] sm:$0xff] %vm222_vm0, %v240_v12 }
  0x91 PF: > { %s13_s11 = sadd.s32 1, %s428_s11   ;;  %s489_s9 = smov %s424_s10 }
  0x92   : > { %p10_p5 = scmp.ge.s32.totalorder %s13_s11, 4   ;;  %s490_s10 = smov %s492_s12 }
  0x94   :  { %12 = sbr.rel (!%p10_p5) target bundleno = 2 (0x2), region = 70 }

// kernel: complex_batchnorm3d.3
= control target key start
LH: loop header
LB: loop body
LE: loop exit
PB: predicated region body
PF: predicated region fallthrough
CT: control target
= control target key end

     0   :  { %s545_s12 = smov 0   ;;  %s547_s13 = smov 0   ;;  %s584_s0 = inlined_call_operand.vmem [shape: f32[2,8,256], index: 0, kind: input, shape index: {}, may-alias: {0,3}]   ;;  %s585_s1 = inlined_call_operand.vmem [shape: f32[2,8,1], index: 1, kind: input, shape index: {}]   ;;  %s586_s2 = inlined_call_operand.vmem [shape: f32[2,8,1], index: 2, kind: input, shape index: {}]   ;;  %s587_s3 = inlined_call_operand.vmem [shape: f32[2,8,256], index: 3, kind: output, shape index: {}, may-alias: {0,3}]  }
   0x1   :  { %s549_s14 = smov 0  }
   0x2 LB: > { %s32_s15 = sadd.s32 1, %s518_s13  ;;  %p463_p0 = scmp.ge.s32.totalorder %s522_s14, 1  ;;  %s522_s14 = sphi %s549_s14, %s13_s14   ;;  %s518_s13 = sphi %s547_s13, %s589_s13   ;;  %s514_s12 = sphi %s545_s12, %s588_s12  }
   0x3   : > { %p34_p1 = scmp.ge.s32.totalorder %s32_s15, 2  ;;  %p201_p2 = scmp.lt.s32.totalorder %s522_s14, 3 }
   0x5   : > { %s591_s15 = smov (%p34_p1, %s32_s15), 0  ;;  %p202_p3 = pnand %p463_p0, %p201_p2 }
   0x6   : > { %p256_p4 = scmp.lt.s32.totalorder (!%p202_p3), %s514_s12, 1 }
   0x7   : > { %205 = sbr.rel (%p202_p3) target bundleno = 143 (0x8f), region = 32 }
   0xc   : > { %v524_v0 = vmov 0   ;;  %s593_s12 = smov (!%p256_p4, %s514_s12), 1 }
   0xd   : > { %499 = vset.pattern.permute.xlu0 %v524_v0  ;;  %s466_s16 = sshll.u32 %s593_s12, 3  ;;  %s472_s23 = sshll.u32 %s593_s12, 4 }
   0xe   : > { %s275_s19 = scalar_lea.vmem %s585_s1, %s466_s16  ;;  %s282_s22 = scalar_lea.vmem %s586_s2, %s466_s16 }
   0xf   : > { %v299_v1 = vld [vmem:[%s275_s19] sm:$0xff]  ;;  %s267_s26 = scalar_lea.vmem %s584_s0, %s472_s23  ;;  %s295_s29 = scalar_lea.vmem %s587_s3, %s472_s23 }
  0x10   : > { %302 = vperm.xlu0 %499, %v299_v1   ;;  %v307_v2 = vld [vmem:[%s282_s22] sm:$0xff]  ;;  %v298_v5 = vld [vmem:[%s267_s26 + $0x8] sm:$0xff] }
  0x11   : > { %v297_v4 = vld [vmem:[%s267_s26] sm:$0xff] }
  0x18   : > { %310 = vperm.xlu0 %499, %v307_v2  }
  0x82   : > { %v303_v3 = vpop.permute.xlu0 %302 }
  0x83   : > { %v305_v6 = vmul.f32 %v303_v3, %v297_v4  ;;  %v306_v7 = vmul.f32 %v303_v3, %v298_v5 }
  0x8a   : > { %v311_v8 = vpop.permute.xlu0 %310 }
  0x8b   : > { %v313_v9 = vadd.f32 %v311_v8, %v305_v6  ;;  %v314_v10 = vadd.f32 %v311_v8, %v306_v7 }
  0x8d   : > { %315 = vst [vmem:[%s295_s29] sm:$0xff] %v313_v9 }
  0x8e   : > { %316 = vst [vmem:[%s295_s29 + $0x8] sm:$0xff] %v314_v10 }
  0x8f PF: > { %s13_s14 = sadd.s32 1, %s522_s14   ;;  %s588_s12 = smov %s518_s13 }
  0x90   : > { %p10_p5 = scmp.ge.s32.totalorder %s13_s14, 4   ;;  %s589_s13 = smov %s591_s15 }
  0x92   :  { %12 = sbr.rel (!%p10_p5) target bundleno = 2 (0x2), region = 68 }

</bundles_post_ra>
